<compile_context>
chip_gen: v6e
topology: v6e:2x2x1
jax: 0.10.0
libtpu: 0.0.40
codegen_flags: <defaults>
</compile_context>

<pallas_src>
import functools

import jax
import jax.numpy as jnp
from jax import lax
from jax.experimental import pallas as pl
from jax.experimental.pallas import tpu as pltpu

NUM_GROUPS = 16
EPS = 1e-5

_LANE = 128
_SUBLANE = 8


def _ceil_to(x, m):
    return ((x + m - 1) // m) * m


def _vmem_capacity_bytes():
    try:
        return int(pltpu.get_tpu_info().vmem_capacity_bytes)
    except Exception:
        return 64 * 1024 * 1024  # conservative fallback (v7x per-TensorCore VMEM)


def _gn_single_pass_kernel(x_ref, o_ref, *, k_true, eps):
    # x_ref / o_ref: (block_rows, K_pad). Padded columns are zeros -> contribute 0
    # to both sums; dividing by the true K keeps mean/var exact.
    x = x_ref[...].astype(jnp.float32)
    s = jnp.sum(x, axis=-1, keepdims=True)
    ss = jnp.sum(x * x, axis=-1, keepdims=True)
    inv_k = 1.0 / float(k_true)
    mean = s * inv_k
    var = jnp.maximum(ss * inv_k - mean * mean, 0.0)  # fused (biased) variance
    inv = lax.rsqrt(var + eps)
    o_ref[...] = ((x - mean) * inv).astype(o_ref.dtype)


def _gn_streaming_kernel(x_ref, o_ref, sum_ref, sumsq_ref, *, nk, k_true, eps):
    # grid axis 1 has 2*nk steps: j in [0, nk) accumulates statistics,
    # j in [nk, 2*nk) re-streams the same K tiles and writes normalized output.
    j = pl.program_id(1)

    @pl.when(j == 0)
    def _():
        sum_ref[...] = jnp.zeros_like(sum_ref)
        sumsq_ref[...] = jnp.zeros_like(sumsq_ref)

    @pl.when(j < nk)  # phase 1: accumulate sum and sum-of-squares
    def _():
        x = x_ref[...].astype(jnp.float32)
        sum_ref[...] += jnp.sum(x, axis=-1, keepdims=True)
        sumsq_ref[...] += jnp.sum(x * x, axis=-1, keepdims=True)

    @pl.when(j == nk - 1)  # end of phase 1: finalize stats (reuse scratch refs)
    def _():
        inv_k = 1.0 / float(k_true)
        mean = sum_ref[...] * inv_k
        var = jnp.maximum(sumsq_ref[...] * inv_k - mean * mean, 0.0)
        sum_ref[...] = mean                    # sum_ref now holds mean
        sumsq_ref[...] = lax.rsqrt(var + eps)  # sumsq_ref now holds 1/std

    @pl.when(j >= nk)  # phase 2: write normalized output tile
    def _():
        x = x_ref[...].astype(jnp.float32)
        o_ref[...] = ((x - sum_ref[...]) * sumsq_ref[...]).astype(o_ref.dtype)


def group_norm(x, num_groups=NUM_GROUPS, eps=EPS, vmem_budget_bytes=None):
    """x: (N, C, H, W) NCHW, C % num_groups == 0. Returns group-normalized x."""
    N, C, H, W = x.shape
    G = num_groups
    assert C % G == 0, "channels must be divisible by num_groups"
    K = (C // G) * H * W
    rows = N * G
    x2 = x.reshape(rows, K)

    itemsize = jnp.dtype(x.dtype).itemsize
    vmem_cap = _vmem_capacity_bytes()
    if vmem_budget_bytes is None:
        # ~10-14 MiB per step on 128 MiB parts, ~6 MiB on 64 MiB parts.
        vmem_budget_bytes = max(vmem_cap // 10, 2 * 1024 * 1024)
    vmem_limit = int(min(vmem_cap, 128 * 1024 * 1024) * 3 // 4)

    # Live VMEM per (row, col) element of a grid step:
    # 2x double-buffered input + 2x double-buffered output + ~1 f32 temp.
    per_elem = 2 * itemsize + 2 * itemsize + 4

    K_pad128 = _ceil_to(K, _LANE)      # lane-dense last dim
    rows_ceil = _ceil_to(rows, _SUBLANE)

    single_pass = per_elem * _SUBLANE * K_pad128 <= vmem_budget_bytes

    cost = pl.CostEstimate(
        flops=int(5 * rows * K),
        transcendentals=int(rows),
        bytes_accessed=int((2 if single_pass else 3) * rows * K * itemsize),
    )
    cparams = pltpu.CompilerParams(
        dimension_semantics=("parallel",) if single_pass else ("parallel", "arbitrary"),
        vmem_limit_bytes=vmem_limit,
    )

    if single_pass:
        # Whole reduction axis resident; pick the largest block_rows that fits the budget.
        block_rows = (vmem_budget_bytes // (per_elem * K_pad128)) // _SUBLANE * _SUBLANE
        block_rows = max(_SUBLANE, min(block_rows, rows_ceil))
        # Keep >= 2 grid steps so both v7x TensorCores get work.
        if rows_ceil >= 2 * _SUBLANE and block_rows >= rows_ceil:
            block_rows = _ceil_to(rows_ceil // 2, _SUBLANE)
        rows_pad = _ceil_to(rows, block_rows)
        K_pad = K_pad128

        if rows_pad != rows or K_pad != K:
            x2 = jnp.pad(x2, ((0, rows_pad - rows), (0, K_pad - K)))

        kernel = functools.partial(_gn_single_pass_kernel, k_true=K, eps=eps)
        out2 = pl.pallas_call(
            kernel,
            out_shape=jax.ShapeDtypeStruct((rows_pad, K_pad), x.dtype),
            grid_spec=pltpu.PrefetchScalarGridSpec(
                num_scalar_prefetch=0,
                grid=(rows_pad // block_rows,),
                in_specs=[pl.BlockSpec((block_rows, K_pad), lambda i: (i, 0))],
                out_specs=pl.BlockSpec((block_rows, K_pad), lambda i: (i, 0)),
            ),
            compiler_params=cparams,
            cost_estimate=cost,
        )(x2)
    else:
        # Streaming two-phase kernel: split K into lane-dense tiles.
        block_rows = _SUBLANE
        max_k = vmem_budget_bytes // (per_elem * block_rows)
        block_k = max(_LANE, (max_k // _LANE) * _LANE)
        block_k = min(block_k, K_pad128)
        K_pad = _ceil_to(K, block_k)
        nk = K_pad // block_k
        rows_pad = _ceil_to(rows, block_rows)

        if rows_pad != rows or K_pad != K:
            x2 = jnp.pad(x2, ((0, rows_pad - rows), (0, K_pad - K)))

        kernel = functools.partial(_gn_streaming_kernel, nk=nk, k_true=K, eps=eps)

        def x_map(i, j):
            # phase 1 streams tiles 0..nk-1, phase 2 streams them again.
            return (i, jnp.where(j < nk, j, j - nk))

        def o_map(i, j):
            # during phase 1 the output block index stays fixed (no writeback);
            # phase 2 walks the K tiles and writes real data before each flush.
            return (i, jnp.where(j < nk, 0, j - nk))

        out2 = pl.pallas_call(
            kernel,
            out_shape=jax.ShapeDtypeStruct((rows_pad, K_pad), x.dtype),
            grid_spec=pltpu.PrefetchScalarGridSpec(
                num_scalar_prefetch=0,
                grid=(rows_pad // block_rows, 2 * nk),
                in_specs=[pl.BlockSpec((block_rows, block_k), x_map)],
                out_specs=pl.BlockSpec((block_rows, block_k), o_map),
                scratch_shapes=[
                    pltpu.VMEM((block_rows, 1), jnp.float32),  # sum -> mean
                    pltpu.VMEM((block_rows, 1), jnp.float32),  # sumsq -> 1/std
                ],
            ),
            compiler_params=cparams,
            cost_estimate=cost,
        )(x2)

    return out2[:rows, :K].reshape(N, C, H, W)


if __name__ == "__main__":
    key = jax.random.PRNGKey(0)

    def _ref(x, G=NUM_GROUPS, eps=EPS):
        N, C, H, W = x.shape
        xr = x.reshape(N, G, -1).astype(jnp.float32)
        mean = jnp.mean(xr, axis=-1, keepdims=True)
        var = jnp.mean((xr - mean) ** 2, axis=-1, keepdims=True)
        y = (xr - mean) / jnp.sqrt(var + eps)
        return y.reshape(N, C, H, W).astype(x.dtype)

    k1, k2, k3 = jax.random.split(key, 3)

    # 1) Main small shape (single-pass path, lane-dense K).
    x1 = jax.random.normal(k1, (2, 32, 8, 8), dtype=jnp.float32)
    o1 = group_norm(x1)
    jax.block_until_ready(o1)
    assert jnp.allclose(o1, _ref(x1), atol=1e-4, rtol=1e-4), "mismatch (single-pass)"

    # 2) Non-128-multiple K (H=W=7) exercises zero-padding + true-K statistics.
    x2 = jax.random.normal(k2, (1, 16, 7, 7), dtype=jnp.float32)
    o2 = group_norm(x2)
    jax.block_until_ready(o2)
    assert jnp.allclose(o2, _ref(x2), atol=1e-4, rtol=1e-4), "mismatch (padded K)"

    # 3) Force the streaming (split-K) path with a tiny VMEM budget.
    x3 = jax.random.normal(k3, (2, 32, 16, 16), dtype=jnp.float32)
    o3 = group_norm(x3, vmem_budget_bytes=64 * 1024)
    jax.block_until_ready(o3)
    assert jnp.allclose(o3, _ref(x3), atol=1e-4, rtol=1e-4), "mismatch (streaming)"

    print("KERNEL_OK")
</pallas_src>

<mosaic_0001>
module attributes {stable_mosaic.version = 11 : i64} {
  func.func @_gn_single_pass_kernel(%arg0: i32, %arg1: memref<16x128xf32, #tpu.memory_space<vmem>>, %arg2: memref<16x128xf32, #tpu.memory_space<vmem>>) attributes {dimension_semantics = [#tpu.dimension_semantics<parallel>], iteration_bounds = array<i64: 2>, scalar_prefetch = 0 : i64, scratch_operands = 0 : i64, tpu.core_type = #tpu.core_type<tc>, window_params = [{transform_indices = @transform_0, window_bounds = array<i64: 16, 128>}, {transform_indices = @transform_1, window_bounds = array<i64: 16, 128>}]} {
    %c0 = arith.constant 0 : index
    %c0_0 = arith.constant 0 : index
    %0 = vector.load %arg1[%c0, %c0_0] : memref<16x128xf32, #tpu.memory_space<vmem>>, vector<16x128xf32>
    %cst = arith.constant dense<0.000000e+00> : vector<16xf32>
    %1 = vector.multi_reduction <add>, %0, %cst [1] : vector<16x128xf32> to vector<16xf32>
    %2 = vector.shape_cast %1 : vector<16xf32> to vector<16x1xf32>
    %3 = arith.mulf %0, %0 : vector<16x128xf32>
    %cst_1 = arith.constant dense<0.000000e+00> : vector<16xf32>
    %4 = vector.multi_reduction <add>, %3, %cst_1 [1] : vector<16x128xf32> to vector<16xf32>
    %5 = vector.shape_cast %4 : vector<16xf32> to vector<16x1xf32>
    %cst_2 = arith.constant 7.812500e-03 : f32
    %6 = vector.broadcast %cst_2 : f32 to vector<16x1xf32>
    %7 = arith.mulf %2, %6 : vector<16x1xf32>
    %cst_3 = arith.constant 7.812500e-03 : f32
    %8 = vector.broadcast %cst_3 : f32 to vector<16x1xf32>
    %9 = arith.mulf %5, %8 : vector<16x1xf32>
    %10 = arith.mulf %7, %7 : vector<16x1xf32>
    %11 = arith.subf %9, %10 : vector<16x1xf32>
    %cst_4 = arith.constant 0.000000e+00 : f32
    %12 = vector.broadcast %cst_4 : f32 to vector<16x1xf32>
    %13 = arith.maximumf %11, %12 : vector<16x1xf32>
    %cst_5 = arith.constant 9.99999974E-6 : f32
    %14 = vector.broadcast %cst_5 : f32 to vector<16x1xf32>
    %15 = arith.addf %13, %14 : vector<16x1xf32>
    %16 = math.rsqrt %15 : vector<16x1xf32>
    %17 = vector.broadcast %7 : vector<16x1xf32> to vector<16x128xf32>
    %18 = arith.subf %0, %17 : vector<16x128xf32>
    %19 = vector.broadcast %16 : vector<16x1xf32> to vector<16x128xf32>
    %20 = arith.mulf %18, %19 : vector<16x128xf32>
    %c0_6 = arith.constant 0 : index
    %c0_7 = arith.constant 0 : index
    %21 = vector.load %arg2[%c0_6, %c0_7] : memref<16x128xf32, #tpu.memory_space<vmem>>, vector<16x128xf32>
    tpu.vector_store %arg2[%c0_6, %c0_7], %20 {strides = array<i32>} : memref<16x128xf32, #tpu.memory_space<vmem>>, vector<16x128xf32>,
    return
  }
  func.func @transform_0(%arg0: i32) -> (i32, i32) {
    %c0_i32 = arith.constant 0 : i32
    %c0_i32_0 = arith.constant 0 : i32
    return %arg0, %c0_i32 : i32, i32
  }
  func.func @transform_1(%arg0: i32) -> (i32, i32) {
    %c0_i32 = arith.constant 0 : i32
    %c0_i32_0 = arith.constant 0 : i32
    return %arg0, %c0_i32 : i32, i32
  }
}

</mosaic_0001>

<bundles_post_ra>
// kernel: tpu_custom_call.1
= control target key start
LH: loop header
LB: loop body
LE: loop exit
PB: predicated region body
PF: predicated region fallthrough
CT: control target
= control target key end

     0   :  { %6 = vsyncpa [#allocation3], 0  ;;  %s594_s0 = inlined_call_operand.hbm [shape: f32[32,128], index: 0, kind: input, shape index: {}]   ;;  %s595_s1 = inlined_call_operand.hbm [shape: f32[32,128], index: 1, kind: output, shape index: {}]  }
   0x1   :  { %8 = vsyncpa [#allocation3 + $0x1], 0 }
   0x2   :  { %9 = vsyncpa [#allocation4], 0 }
   0x3   :  { %11 = vsyncpa [#allocation4 + $0x1], 0  ;;  %s436_s6 = smov 0   ;;  %s438_s7 = smov 0  }
   0x4   :  { %s440_s8 = smov 0   ;;  %s442_s9 = smov 0  }
   0x5 LB: > { %s457_s10 = sadd.s32 4294967295, %s418_s9   ;;  %s256_s11 = sadd.s32 4294967294, %s418_s9   ;;  %s418_s9 = sphi %s442_s9, %s610_s9   ;;  %s414_s8 = sphi %s440_s8, %s609_s8   ;;  %s410_s7 = sphi %s438_s7, %s608_s7   ;;  %s406_s6 = sphi %s436_s6, %s607_s6  }
   0x6   : > { %s461_s12 = sadd.s32 1, %s418_s9   ;;  %s24_s13 = sadd.s32 1, %s414_s8 }
   0x7   : > { %s21_s14 = ssub.s32 %s418_s9, %s461_s12  ;;  %p31_p0 = scmp.ne.s32.totalorder %s414_s8, %s410_s7 }
   0x8   : > { %p22_p1 = scmp.eq.s32.totalorder %s21_s14, 0  ;;  %p32_p2 = scmp.eq.s32.totalorder %s418_s9, 0 }
   0x9   : > { %p37_p3 = scmp.ne.s32.totalorder %s410_s7, %s406_s6  ;;  %p38_p4 = scmp.eq.s32.totalorder %s457_s10, 0 }
   0xa   : > { %s473_s15 = scalar_select %p22_p1, %s414_s8, %s24_s13  }
   0xb   : > { %p475_p5 = por %p32_p2, %p31_p0  ;;  %p479_p6 = por %p38_p4, %p37_p3 }
   0xc   : > { %p61_p7 = scmp.eq.s32.totalorder %s457_s10, 1  ;;  %p67_p8 = scmp.eq.s32.totalorder %s256_s11, 1 }
   0xd   : > { %s599_s17 = scalar_select %p479_p6, 1, 0 }
   0xe   : > { %p284_p10 = scmp.lt.s32.totalorder %s418_s9, 2  ;;  %p486_p11 = por %p61_p7, %p31_p0 }
   0xf   : > { %p490_p12 = por %p67_p8, %p37_p3  ;;  %s87_s20 = sand.u32 1, %s414_s8  }
  0x10   : > { %s600_s18 = scalar_select %p486_p11, 1, 0 }
  0x11   : > { %s601_s19 = scalar_select %p490_p12, 1, 0 }
  0x12   : > { %s270_s21 = sshll.u32 %s418_s9, 8  ;;  %s259_s22 = sshll.u32 %s87_s20, 4 }
  0x13   : > { %s499_s25 = scalar_lea.hbm %s594_s0, %s270_s21  ;;  %s91_s26 = scalar_lea.vmem [#allocation2], %s259_s22 }
  0x14   : > { %s98_s27 = sshll.u32 %s91_s26, 4  ;;  %p503_p13 = pnand %p284_p10, %p475_p5  ;;  %s507_s27 = int_to_ptr.vmem [resolvable:$true] %s98_s27 }
  0x15   : > { %s509_s29 = scalar_lea.sflag [#allocation3], %s87_s20  ;;  %s326_s30 = scalar_lea.hbm %s499_s25, 256 }
  0x16   : > { %p327_p0 = scmp.ne.s32.totalorder %s499_s25, %s326_s30  ;;  %p328_p1 = pneg %p503_p13 }
  0x17   : > { %s331_s4 = scalar_lea.hbm %s594_s0, 512  ;;  %p332_p4 = scmp.lt.s32.totalorder %s499_s25, %s594_s0 }
  0x18   : > { %p329_p2 = pnand %p328_p1, %p327_p0  ;;  %p333_p5 = scmp.lt.s32.totalorder %s331_s4, %s326_s30 }
  0x1a   : > { %p330_p3 = pneg %p329_p2  ;;  %p334_p7 = por %p333_p5, %p332_p4 }
  0x1c   : > { %p335_p8 = pnand %p334_p7, %p330_p3 }
  0x1e   : > { %338 = shalt.err (!%p335_p8)
}
  0x1f   : > { %s339_s13 = scalar_lea.vmem %s507_s27, 256  ;;  %s420_s14 = smov [#allocation2]  }
  0x20   : > { %p340_p10 = scmp.ne.s32.totalorder %s507_s27, %s339_s13  ;;  %s344_s16 = sshll.u32 %s420_s14, 4  ;;  %s345_s16 = int_to_ptr.vmem [resolvable:$false] %s344_s16 }
  0x21   : > { %s346_s20 = scalar_lea.vmem %s345_s16, 512  ;;  %p347_p2 = scmp.lt.s32.totalorder %s507_s27, %s345_s16 }
  0x22   : > { %p342_p9 = pnand %p340_p10, %p328_p1  ;;  %p348_p12 = scmp.lt.s32.totalorder %s346_s20, %s339_s13 }
  0x24   : > { %p343_p0 = pneg %p342_p9  ;;  %p349_p11 = por %p348_p12, %p347_p2 }
  0x26   : > { %p350_p6 = pnand %p349_p11, %p343_p0 }
  0x28   : > { %353 = shalt.err (!%p350_p6)
}
  0x29   : > { %s421_s21 = smov 128   ;;  %s422_s22 = smov 8  }
  0x2a   : > { %279 = dma.hbm_to_vmem [thread:$0]  (!%p503_p13), %s499_s25, 256, %s507_s27, %s509_s29, %s421_s21, %s421_s21, %s422_s22  }
  0x2b   : > { %p262_p9 = scmp.ge.s32.totalorder %s418_s9, 1  ;;  %p106_p1 = scmp.lt.s32.totalorder %s418_s9, 3 }
  0x2d   : > { %p107_p3 = pnand %p262_p9, %p106_p1 }
  0x2e   : > { %s533_s23 = sand.u32 (!%p107_p3), 1, %s410_s7   ;;  %p603_p6 = scmp.ne.s32.totalorder (!%p107_p3), %s599_s17, 0 }
  0x2f   : > { %110 = sbr.rel (%p107_p3) target bundleno = 236 (0xec), region = 24  ;;  %s263_s24 = sshll.u32 (!%p107_p3), %s533_s23, 4 }
  0x30   : > { %s113_s26 = scalar_lea.sflag (!%p107_p3), [#allocation3], %s533_s23  ;;  %s116_s30 = scalar_lea.vmem (!%p107_p3), [#allocation2], %s263_s24 }
  0x34   : > { %397 = dma.done.wait (%p603_p6), %s113_s26, 256  }
  0x35   : > { %399 = vsyncadd (%p603_p6), %s113_s26, 4294967040  ;;  %v137_v0 = vld [vmem:[%s116_s30] sm:$0xff]  ;;  %v138_v1 = vld [vmem:[%s116_s30 + $0x8] sm:$0xff]  ;;  %s271_s17 = sshll.u32 %s457_s10, 8  ;;  %s134_s25 = scalar_lea.vmem [#allocation5], %s263_s24 }
  0x36   : > { %139 = vadd.xlane.f32.xlu0 %v137_v0  ;;  %v143_v2 = vmul.f32 %v137_v0, %v137_v0  ;;  %v144_v3 = vmul.f32 %v138_v1, %v138_v1  ;;  %s183_s27 = sshll.u32 %s134_s25, 4  ;;  %s549_s2 = scalar_lea.hbm %s595_s1, %s271_s17  ;;  %s551_s27 = int_to_ptr.vmem [resolvable:$true] %s183_s27 }
  0x37   : > { %s170_s3 = scalar_lea.sflag [#allocation4], %s533_s23  ;;  %s354_s10 = scalar_lea.vmem %s551_s27, 256 }
  0x38   : > { %145 = vadd.xlane.f32.xlu1 %v143_v2  ;;  %p355_p11 = scmp.ne.s32.totalorder %s551_s27, %s354_s10  ;;  %p604_p12 = scmp.ne.s32.totalorder %s600_s18, 0 }
  0x39   : > { %s423_s4 = smov [#allocation5]  }
  0x3a   : > { %141 = vadd.xlane.f32.xlu0 %v138_v1  ;;  %p356_p13 = pnand %p355_p11, %p604_p12  ;;  %s358_s5 = sshll.u32 %s423_s4, 4  ;;  %s359_s5 = int_to_ptr.vmem [resolvable:$false] %s358_s5 }
  0x3b   : > { %s360_s11 = scalar_lea.vmem %s359_s5, 512  ;;  %p361_p5 = scmp.lt.s32.totalorder %s551_s27, %s359_s5 }
  0x3c   : > { %147 = vadd.xlane.f32.xlu1 %v144_v3  ;;  %p357_p4 = pneg %p356_p13  ;;  %p362_p7 = scmp.lt.s32.totalorder %s360_s11, %s354_s10 }
  0x3e   : > { %p363_p8 = por %p362_p7, %p361_p5 }
  0x40   : > { %p364_p10 = pnand %p363_p8, %p357_p4 }
  0xbf   : > { %v140_v4 = vpop.xlane.xlu0 %139 }
  0xc0   : > { %v149_v5 = vmul.f32 0.0078125, %v140_v4 }
  0xc1   : > { %v146_v6 = vpop.xlane.xlu1 %145 }
  0xc2   : > { %v153_v7 = vmul.f32 %v149_v5, %v149_v5  ;;  %v151_v8 = vmul.f32 0.0078125, %v146_v6  ;;  %v163_v20 = vsub.f32 %v137_v0, %v149_v5 }
  0xc3   : > { %v142_v9 = vpop.xlane.xlu0 %141 }
  0xc4   : > { %v155_v10 = vsub.f32 %v151_v8, %v153_v7  ;;  %v150_v11 = vmul.f32 0.0078125, %v142_v9 }
  0xc5   : > { %v148_v12 = vpop.xlane.xlu1 %147 }
  0xc6   : > { %v157_v13 = vmax.f32 %v155_v10, 0.0  ;;  %v154_v14 = vmul.f32 %v150_v11, %v150_v11  ;;  %v152_v15 = vmul.f32 0.0078125, %v148_v12  ;;  %v164_v23 = vsub.f32 %v138_v1, %v150_v11 }
  0xc8   : > { %v159_v16 = vadd.f32 1e-05, %v157_v13  ;;  %v156_v17 = vsub.f32 %v152_v15, %v154_v14 }
  0xca   : > { %322 = vrsqrt.f32 %v159_v16  ;;  %v158_v18 = vmax.f32 %v156_v17, 0.0 }
  0xcc   : > { %v160_v19 = vadd.f32 1e-05, %v158_v18 }
  0xce   : > { %324 = vrsqrt.f32 %v160_v19 }
  0xd7   : > { %v323_v21 = vpop.eup %322 }
  0xd8   : > { %v165_v22 = vmul.f32 %v323_v21, %v163_v20 }
  0xda   : > { %167 = vst [vmem:[%s134_s25] sm:$0xff] %v165_v22 }
  0xdb   : > { %v325_v24 = vpop.eup %324 }
  0xdc   : > { %v166_v25 = vmul.f32 %v325_v24, %v164_v23 }
  0xde   : > { %168 = vst [vmem:[%s134_s25 + $0x8] sm:$0xff] %v166_v25 }
  0xdf   : > { %367 = shalt.err (!%p364_p10)
}
  0xe0   : > { %s368_s13 = scalar_lea.hbm %s549_s2, 256  ;;  %s372_s20 = scalar_lea.hbm %s595_s1, 512 }
  0xe1   : > { %p369_p0 = scmp.ne.s32.totalorder %s549_s2, %s368_s13  ;;  %p373_p1 = scmp.lt.s32.totalorder %s549_s2, %s595_s1 }
  0xe2   : > { %p374_p3 = scmp.lt.s32.totalorder %s372_s20, %s368_s13 }
  0xe3   : > { %p370_p2 = pnand %p369_p0, %p604_p12 }
  0xe4   : > { %p375_p6 = por %p374_p3, %p373_p1 }
  0xe5   : > { %p371_p9 = pneg %p370_p2 }
  0xe7   : > { %p376_p11 = pnand %p375_p6, %p371_p9 }
  0xe9   : > { %379 = shalt.err (!%p376_p11)
}
  0xea   : > { %s424_s24 = smov 128   ;;  %s425_s26 = smov 8  }
  0xeb   : > { %274 = dma.vmem_to_hbm [thread:$0]  (%p604_p12), %s551_s27, 256, %s549_s2, %s170_s3, %s424_s24, %s424_s24, %s425_s26  }
  0xec PF: > { %s198_s30 = sand.u32 1, %s406_s6   ;;  %p605_p13 = scmp.ne.s32.totalorder %s601_s19, 0 }
  0xed   : > { %p606_p4 = scmp.ge.s32.totalorder %s418_s9, 2  ;;  %s199_s17 = scalar_lea.sflag [#allocation4], %s198_s30 }
  0xef   : > { %p281_p5 = pnand %p606_p4, %p605_p13 }
  0xf1   : > { %p282_p7 = pneg %p281_p5 }
  0xf3   : > { %401 = dma.done.wait (%p282_p7), %s199_s17, 256  }
  0xf4   : > { %403 = vsyncadd (%p282_p7), %s199_s17, 4294967040  ;;  %p14_p8 = scmp.ge.s32.totalorder %s461_s12, 4   ;;  %s607_s6 = smov %s410_s7 }
  0xf5   : > { %s608_s7 = smov %s414_s8  ;;  %s609_s8 = smov %s473_s15 }
  0xf6   : > { %s610_s9 = smov %s461_s12  ;;  %16 = sbr.rel (!%p14_p8) target bundleno = 5 (0x5), region = 69 }
  0xfb   :  { %204 = vsyncpa [#allocation3], 1 }
  0xfc   :  { %206 = vsyncpa [#allocation3 + $0x1], 1 }
  0xfd   :  { %207 = vsyncpa [#allocation4], 1 }
  0xfe   :  { %209 = vsyncpa [#allocation4 + $0x1], 1 }

</bundles_post_ra>
